<compile_context>
chip_gen: v7x
topology: tpu7x:2x2x1
jax: 0.10.0
libtpu: 0.0.40
codegen_flags: <defaults>
</compile_context>

<pallas_src>
import math

import jax
import jax.numpy as jnp
from jax.experimental import pallas as pl
from jax.experimental.pallas import tpu as pltpu

INPUT_PIXEL_SIZE = 8e-06
UPSAMPLED_PIXEL_SIZE = 7.56e-06


# ----------------------------- Pallas kernel --------------------------------

def _slm_mul_kernel(re_ref, im_ref, w_ref, ore_ref, oim_ref):
    # (complex field) * (real SLM transmission):  out = (re * w, im * w)
    w = w_ref[...]                       # (1, tile_l) -> broadcast over rows
    ore_ref[...] = re_ref[...] * w
    oim_ref[...] = im_ref[...] * w


def _choose_tiles(N, Lp):
    """Generation-aware block sizing for the streaming multiply."""
    try:
        vmem_cap = int(pltpu.get_tpu_info().vmem_capacity_bytes)
    except Exception:
        vmem_cap = 64 << 20              # conservative fallback (v7x physical)

    # 4 large double-buffered f32 streams (re/im in, re/im out) -> 8 resident
    # blocks; keep >= 2x headroom vs. physical VMEM.
    block_bytes = max(1 << 20, min(16 << 20, (vmem_cap // 2) // 8))
    vmem_limit = int(min(vmem_cap * 3 // 4, 96 << 20))

    # Grow the lane tile first (long contiguous DMA rows, lane-dense stores),
    # then the row tile.  Lp is already a multiple of 128; tile_n is a
    # multiple of 8 unless it covers the full row count.
    max_lanes = max(128, ((block_bytes // (8 * 4)) // 128) * 128)
    tile_l = Lp if Lp <= max_lanes else max_lanes
    max_rows = max(8, block_bytes // (tile_l * 4))
    tile_n = N if N <= max_rows else max(8, (max_rows // 8) * 8)

    # v7x has 2 TensorCores: give big fields at least 2 "parallel" grid steps.
    if pl.cdiv(N, tile_n) * pl.cdiv(Lp, tile_l) == 1 and N * Lp * 4 >= (1 << 20):
        if Lp >= 256:
            tile_l = ((pl.cdiv(Lp, 2) + 127) // 128) * 128
        elif N >= 16:
            tile_n = max(8, ((N // 2) // 8) * 8)
    return tile_n, tile_l, vmem_limit


def _apply_slm_pallas(x_up, w):
    """x_up: complex64 (B, C, Hu, Wu); w: float32 (Hu, Wu) -> complex64 same shape."""
    B, C, Hu, Wu = x_up.shape
    N, L = B * C, Hu * Wu
    Lp = ((L + 127) // 128) * 128        # lane-dense width (multiple of 128)
    pad = Lp - L

    # complex64 -> two f32 planes.  XLA fuses the real/imag extraction and the
    # zero-pad into a single read of the complex buffer.  (complex64 cannot be
    # bitcast to f32 in XLA, so this single split pass is unavoidable.)
    re = jnp.real(x_up).reshape(N, L)
    im = jnp.imag(x_up).reshape(N, L)
    w2 = w.astype(jnp.float32).reshape(1, L)
    if pad:
        re = jnp.pad(re, ((0, 0), (0, pad)))
        im = jnp.pad(im, ((0, 0), (0, pad)))
        w2 = jnp.pad(w2, ((0, 0), (0, pad)))

    tile_n, tile_l, vmem_limit = _choose_tiles(N, Lp)
    # Lane-block index outermost so the broadcast weight row keeps the same
    # block index between consecutive steps (Pallas elides its re-DMA).
    grid = (pl.cdiv(Lp, tile_l), pl.cdiv(N, tile_n))

    x_spec = pl.BlockSpec((tile_n, tile_l), lambda j, i: (i, j))
    w_spec = pl.BlockSpec((1, tile_l), lambda j, i: (0, j))

    ore, oim = pl.pallas_call(
        _slm_mul_kernel,
        out_shape=(jax.ShapeDtypeStruct((N, Lp), jnp.float32),
                   jax.ShapeDtypeStruct((N, Lp), jnp.float32)),
        grid_spec=pltpu.PrefetchScalarGridSpec(
            num_scalar_prefetch=0,
            grid=grid,
            in_specs=[x_spec, x_spec, w_spec],
            out_specs=(x_spec, x_spec),
        ),
        # Multiply in place: donate the re/im temporaries to the outputs.
        input_output_aliases={0: 0, 1: 1},
        compiler_params=pltpu.CompilerParams(
            dimension_semantics=("parallel", "parallel"),
            vmem_limit_bytes=vmem_limit,
        ),
    )(re, im, w2)

    out = jax.lax.complex(ore[:, :L], oim[:, :L])
    return out.reshape(B, C, Hu, Wu)


# --------------------------- JAX glue (non-Pallas) ---------------------------

def _make_pixel_response(upsampled_size, input_pixel_size, upsampled_pixel_size):
    scale_factor = upsampled_pixel_size / input_pixel_size
    lo = -upsampled_size // 2            # same precedence as the PyTorch code
    hi = upsampled_size // 2
    g = jnp.linspace(lo, hi, upsampled_size)
    gx, gy = jnp.meshgrid(g, g, indexing='ij')
    sigma = 0.5 / scale_factor
    # Intentionally NOT normalized, to match the PyTorch buffer.
    return jnp.exp(-(gx ** 2 + gy ** 2) / (2 * sigma ** 2)).astype(jnp.float32)


def _binary_effective_weights(pixel_weights, fill_factor):
    binary = (jax.nn.sigmoid(pixel_weights) > 0.5).astype(jnp.float32)
    return binary * jnp.float32(fill_factor)


def _filter_weights_full(effective, pixel_response):
    # Faithful port of F.conv2d(effective, full-size kernel, padding=size//2).
    Hu, Wu = effective.shape
    out = jax.lax.conv_general_dilated(
        effective[None, None], pixel_response[None, None],
        window_strides=(1, 1),
        padding=[(Hu // 2, Hu // 2), (Wu // 2, Wu // 2)],
        dimension_numbers=('NCHW', 'OIHW', 'NCHW'))
    return out[0, 0]                     # (Hu, Wu) for odd upsampled_size


def _filter_weights_truncated(effective, pixel_response, radius):
    # Crop the Gaussian around the full-size kernel's centre tap (Hu//2, Wu//2).
    # Dropped taps are < 1e-30, so this matches the full conv to f32 precision
    # while being O(r^2) instead of O(Hu*Wu) work per output pixel.
    Hu, Wu = effective.shape
    ch, cw = Hu // 2, Wu // 2
    r = min(radius, ch, Hu - 1 - ch, cw, Wu - 1 - cw)
    k = pixel_response[ch - r:ch + r + 1, cw - r:cw + r + 1]
    out = jax.lax.conv_general_dilated(
        effective[None, None], k[None, None],
        window_strides=(1, 1),
        padding=[(r, r), (r, r)],
        dimension_numbers=('NCHW', 'OIHW', 'NCHW'))
    return out[0, 0]


def _fft_resample(x, target_size, mode, src_pixel_size, target_pixel_size):
    """Fourier-domain zero-pad / crop resampling (NonLinearLayer.fft_resample)."""
    input_size = x.shape[-1]
    X = jnp.fft.fftshift(jnp.fft.fft2(jnp.fft.ifftshift(x, axes=(-2, -1))),
                         axes=(-2, -1))
    if mode == 'up':
        pad = (target_size - input_size) // 2
        X = jnp.pad(X, ((0, 0), (0, 0), (pad, pad), (pad, pad)))
    else:
        start = (input_size - target_size) // 2
        X = X[:, :, start:start + target_size, start:start + target_size]
    x_res = jnp.fft.fftshift(jnp.fft.ifft2(jnp.fft.ifftshift(X, axes=(-2, -1))),
                             axes=(-2, -1))
    energy_scale = (src_pixel_size / target_pixel_size) ** 2
    return x_res * math.sqrt(energy_scale)


def make_nonlinear_layer_forward(input_size, upsampled_size,
                                 input_pixel_size=INPUT_PIXEL_SIZE,
                                 upsampled_pixel_size=UPSAMPLED_PIXEL_SIZE,
                                 fill_factor=0.93,
                                 use_pallas=True):
    pixel_response = _make_pixel_response(upsampled_size, input_pixel_size,
                                          upsampled_pixel_size)
    scale_factor = upsampled_pixel_size / input_pixel_size
    sigma = 0.5 / scale_factor
    trunc_radius = max(3, int(math.ceil(6.0 * sigma)) + 1)
    s_up = input_pixel_size / upsampled_pixel_size     # sqrt(energy_scale), up
    s_down = upsampled_pixel_size / input_pixel_size   # sqrt(energy_scale), down

    @jax.jit
    def forward(x, pixel_weights):
        original_ndim = x.ndim
        if original_ndim == 2:
            x4 = x[None, None]
        elif original_ndim == 3:
            x4 = x[:, None]
        else:
            x4 = x
        x4 = x4.astype(jnp.complex64)

        effective = _binary_effective_weights(pixel_weights, fill_factor)

        if use_pallas:
            # --- optimized path -------------------------------------------
            H = x4.shape[-1]
            # FFT-domain zero-pad upsampling, WITHOUT fftshift-ing the ifft2
            # output: the fftshift here and the ifftshift opening the
            # downsample cancel once folded into the tiny weight map
            # (permutation identity), saving two full field passes.
            X = jnp.fft.fftshift(
                jnp.fft.fft2(jnp.fft.ifftshift(x4, axes=(-2, -1))),
                axes=(-2, -1))
            pad = (upsampled_size - H) // 2
            Xp = jnp.pad(X, ((0, 0), (0, 0), (pad, pad), (pad, pad)))
            y = jnp.fft.ifft2(jnp.fft.ifftshift(Xp, axes=(-2, -1)))

            w = _filter_weights_truncated(effective, pixel_response,
                                          trunc_radius)
            w_folded = jnp.fft.ifftshift(w) * jnp.float32(s_up)

            y_proc = _apply_slm_pallas(y, w_folded)       # Pallas hot path

            # Downsample: y_proc already equals ifftshift(x_processed).
            X2 = jnp.fft.fftshift(jnp.fft.fft2(y_proc), axes=(-2, -1))
            start = (upsampled_size - input_size) // 2
            X2 = X2[:, :, start:start + input_size, start:start + input_size]
            x_down = jnp.fft.fftshift(
                jnp.fft.ifft2(jnp.fft.ifftshift(X2, axes=(-2, -1))),
                axes=(-2, -1)) * jnp.float32(s_down)
        else:
            # --- faithful pure-XLA reference path --------------------------
            x_up = _fft_resample(x4, upsampled_size, 'up',
                                 input_pixel_size, upsampled_pixel_size)
            w = _filter_weights_full(effective, pixel_response)
            x_proc = x_up * w
            x_down = _fft_resample(x_proc, input_size, 'down',
                                   upsampled_pixel_size, input_pixel_size)

        if original_ndim == 2:
            return x_down[0, 0]
        elif original_ndim == 3:
            return x_down[:, 0]
        return x_down

    return forward


if __name__ == "__main__":
    # The reference module's pad / conv arithmetic is only shape-consistent when
    # upsampled_size is odd and (upsampled_size - input_size) is even, so the
    # small demo uses 17 -> 25 (nearest to the suggested spatial=16).
    input_size = 17
    upsampled_size = 25
    B, C = 2, 4

    key = jax.random.PRNGKey(0)
    k_re, k_im, k_w = jax.random.split(key, 3)
    x = (jax.random.normal(k_re, (B, C, input_size, input_size), dtype=jnp.float32)
         + 1j * jax.random.normal(k_im, (B, C, input_size, input_size),
                                  dtype=jnp.float32))
    pixel_weights = jax.random.uniform(k_w, (upsampled_size, upsampled_size),
                                       minval=-1.0, maxval=1.0,
                                       dtype=jnp.float32)

    fwd = make_nonlinear_layer_forward(input_size, upsampled_size)
    out = jax.block_until_ready(fwd(x, pixel_weights))

    ref_fwd = make_nonlinear_layer_forward(input_size, upsampled_size,
                                           use_pallas=False)
    ref = jax.block_until_ready(ref_fwd(x, pixel_weights))

    assert out.shape == (B, C, input_size, input_size)
    assert jnp.iscomplexobj(out)
    assert jnp.allclose(out, ref, rtol=1e-4, atol=1e-4), \
        float(jnp.max(jnp.abs(out - ref)))

    print("KERNEL_OK")
</pallas_src>

<mosaic_0001>
module attributes {stable_mosaic.version = 11 : i64} {
  func.func @_slm_mul_kernel(%arg0: i32, %arg1: i32, %arg2: memref<8x640xf32, #tpu.memory_space<vmem>>, %arg3: memref<8x640xf32, #tpu.memory_space<vmem>>, %arg4: memref<1x640xf32, #tpu.memory_space<vmem>>, %arg5: memref<8x640xf32, #tpu.memory_space<vmem>>, %arg6: memref<8x640xf32, #tpu.memory_space<vmem>>) attributes {dimension_semantics = [#tpu.dimension_semantics<parallel>, #tpu.dimension_semantics<parallel>], iteration_bounds = array<i64: 1, 1>, scalar_prefetch = 0 : i64, scratch_operands = 0 : i64, tpu.core_type = #tpu.core_type<tc>, window_params = [{transform_indices = @transform_0, window_bounds = array<i64: 8, 640>}, {transform_indices = @transform_1, window_bounds = array<i64: 8, 640>}, {transform_indices = @transform_2, window_bounds = array<i64: 1, 640>}, {transform_indices = @transform_3, window_bounds = array<i64: 8, 640>}, {transform_indices = @transform_4, window_bounds = array<i64: 8, 640>}]} {
    %c0 = arith.constant 0 : index
    %c0_0 = arith.constant 0 : index
    %0 = vector.load %arg4[%c0, %c0_0] : memref<1x640xf32, #tpu.memory_space<vmem>>, vector<1x640xf32>
    %c0_1 = arith.constant 0 : index
    %c0_2 = arith.constant 0 : index
    %1 = vector.load %arg2[%c0_1, %c0_2] : memref<8x640xf32, #tpu.memory_space<vmem>>, vector<8x640xf32>
    %2 = vector.broadcast %0 : vector<1x640xf32> to vector<8x640xf32>
    %3 = arith.mulf %1, %2 : vector<8x640xf32>
    %c0_3 = arith.constant 0 : index
    %c0_4 = arith.constant 0 : index
    %4 = vector.load %arg5[%c0_3, %c0_4] : memref<8x640xf32, #tpu.memory_space<vmem>>, vector<8x640xf32>
    tpu.vector_store %arg5[%c0_3, %c0_4], %3 {strides = array<i32>} : memref<8x640xf32, #tpu.memory_space<vmem>>, vector<8x640xf32>,
    %c0_5 = arith.constant 0 : index
    %c0_6 = arith.constant 0 : index
    %5 = vector.load %arg3[%c0_5, %c0_6] : memref<8x640xf32, #tpu.memory_space<vmem>>, vector<8x640xf32>
    %6 = vector.broadcast %0 : vector<1x640xf32> to vector<8x640xf32>
    %7 = arith.mulf %5, %6 : vector<8x640xf32>
    %c0_7 = arith.constant 0 : index
    %c0_8 = arith.constant 0 : index
    %8 = vector.load %arg6[%c0_7, %c0_8] : memref<8x640xf32, #tpu.memory_space<vmem>>, vector<8x640xf32>
    tpu.vector_store %arg6[%c0_7, %c0_8], %7 {strides = array<i32>} : memref<8x640xf32, #tpu.memory_space<vmem>>, vector<8x640xf32>,
    return
  }
  func.func @transform_0(%arg0: i32, %arg1: i32) -> (i32, i32) {
    %c0_i32 = arith.constant 0 : i32
    return %arg1, %arg0 : i32, i32
  }
  func.func @transform_1(%arg0: i32, %arg1: i32) -> (i32, i32) {
    %c0_i32 = arith.constant 0 : i32
    return %arg1, %arg0 : i32, i32
  }
  func.func @transform_2(%arg0: i32, %arg1: i32) -> (i32, i32) {
    %c0_i32 = arith.constant 0 : i32
    %c0_i32_0 = arith.constant 0 : i32
    return %c0_i32, %arg0 : i32, i32
  }
  func.func @transform_3(%arg0: i32, %arg1: i32) -> (i32, i32) {
    %c0_i32 = arith.constant 0 : i32
    return %arg1, %arg0 : i32, i32
  }
  func.func @transform_4(%arg0: i32, %arg1: i32) -> (i32, i32) {
    %c0_i32 = arith.constant 0 : i32
    return %arg1, %arg0 : i32, i32
  }
}

</mosaic_0001>

<bundles_post_ra>
// kernel: custom-call.1
= control target key start
LH: loop header
LB: loop body
LE: loop exit
PB: predicated region body
PF: predicated region fallthrough
CT: control target
= control target key end

     0   :  { %s321_s0 = inlined_call_operand.vmem [shape: c64[2,4,17,17], index: 0, kind: input, shape index: {}]   ;;  %s322_s1 = inlined_call_operand.vmem [shape: f32[2,4,17,17], index: 1, kind: output, shape index: {}]  }
   0x1   :  { %v120_v0 = vld [vmem:[%s321_s0 + $0xc0] sm:$0xff]  ;;  %v121_v1 = vld [vmem:[%s321_s0 + $0xc8] sm:$0xff]  ;;  %v123_v2 = vld [vmem:[%s321_s0 + $0xd0] sm:$0xff] }
   0x2   :  { %4 = vst [vmem:[%s322_s1] sm:$0xff] %v120_v0  ;;  %122 = vst [vmem:[%s322_s1 + $0x8] sm:$0xff] %v121_v1  ;;  %v125_v3 = vld [vmem:[%s321_s0 + $0xd8] sm:$0xff]  ;;  %v127_v4 = vld [vmem:[%s321_s0 + $0xe0] sm:$0xff] }
   0x3   :  { %124 = vst [vmem:[%s322_s1 + $0x10] sm:$0xff] %v123_v2  ;;  %v129_v5 = vld [vmem:[%s321_s0 + $0xe8] sm:$0xff]  ;;  %126 = vst [vmem:[%s322_s1 + $0x18] sm:$0xff] %v125_v3  ;;  %v131_v6 = vld [vmem:[%s321_s0 + $0xf0] sm:$0xff] }
   0x4   :  { %128 = vst [vmem:[%s322_s1 + $0x20] sm:$0xff] %v127_v4  ;;  %130 = vst [vmem:[%s322_s1 + $0x28] sm:$0xff] %v129_v5  ;;  %v133_v7 = vld [vmem:[%s321_s0 + $0xf8] sm:$0xff]  ;;  %v135_v8 = vld [vmem:[%s321_s0 + $0x100] sm:$0xff] }
   0x5   :  { %132 = vst [vmem:[%s322_s1 + $0x30] sm:$0xff] %v131_v6  ;;  %134 = vst [vmem:[%s322_s1 + $0x38] sm:$0xff] %v133_v7  ;;  %v137_v9 = vld [vmem:[%s321_s0 + $0x108] sm:$0xff]  ;;  %v139_v10 = vld [vmem:[%s321_s0 + $0x110] sm:$0xff] }
   0x6   :  { %136 = vst [vmem:[%s322_s1 + $0x40] sm:$0xff] %v135_v8  ;;  %v141_v11 = vld [vmem:[%s321_s0 + $0x118] sm:$0xff]  ;;  %138 = vst [vmem:[%s322_s1 + $0x48] sm:$0xff] %v137_v9  ;;  %v143_v12 = vld [vmem:[%s321_s0 + $0x120] sm:$0xff] }
   0x7   :  { %140 = vst [vmem:[%s322_s1 + $0x50] sm:$0xff] %v139_v10  ;;  %142 = vst [vmem:[%s322_s1 + $0x58] sm:$0xff] %v141_v11  ;;  %v145_v13 = vld [vmem:[%s321_s0 + $0x128] sm:$0xff]  ;;  %v147_v14 = vld [vmem:[%s321_s0 + $0x130] sm:$0xff] }
   0x8   :  { %144 = vst [vmem:[%s322_s1 + $0x60] sm:$0xff] %v143_v12  ;;  %146 = vst [vmem:[%s322_s1 + $0x68] sm:$0xff] %v145_v13  ;;  %v149_v15 = vld [vmem:[%s321_s0 + $0x138] sm:$0xff]  ;;  %v151_v16 = vld [vmem:[%s321_s0 + $0x140] sm:$0xff] }
   0x9   :  { %148 = vst [vmem:[%s322_s1 + $0x70] sm:$0xff] %v147_v14  ;;  %v153_v17 = vld [vmem:[%s321_s0 + $0x148] sm:$0xff]  ;;  %150 = vst [vmem:[%s322_s1 + $0x78] sm:$0xff] %v149_v15  ;;  %v155_v18 = vld [vmem:[%s321_s0 + $0x150] sm:$0xff] }
   0xa   :  { %152 = vst [vmem:[%s322_s1 + $0x80] sm:$0xff] %v151_v16  ;;  %154 = vst [vmem:[%s322_s1 + $0x88] sm:$0xff] %v153_v17  ;;  %v157_v19 = vld [vmem:[%s321_s0 + $0x158] sm:$0xff]  ;;  %v159_v20 = vld [vmem:[%s321_s0 + $0x160] sm:$0xff] }
   0xb   :  { %156 = vst [vmem:[%s322_s1 + $0x90] sm:$0xff] %v155_v18  ;;  %158 = vst [vmem:[%s322_s1 + $0x98] sm:$0xff] %v157_v19  ;;  %v161_v21 = vld [vmem:[%s321_s0 + $0x168] sm:$0xff]  ;;  %v163_v22 = vld [vmem:[%s321_s0 + $0x170] sm:$0xff] }
   0xc   :  { %160 = vst [vmem:[%s322_s1 + $0xa0] sm:$0xff] %v159_v20  ;;  %v165_v23 = vld [vmem:[%s321_s0 + $0x178] sm:$0xff]  ;;  %162 = vst [vmem:[%s322_s1 + $0xa8] sm:$0xff] %v161_v21 }
   0xd   :  { %164 = vst [vmem:[%s322_s1 + $0xb0] sm:$0xff] %v163_v22  ;;  %166 = vst [vmem:[%s322_s1 + $0xb8] sm:$0xff] %v165_v23 }

// kernel: custom-call
= control target key start
LH: loop header
LB: loop body
LE: loop exit
PB: predicated region body
PF: predicated region fallthrough
CT: control target
= control target key end

     0   :  { %s296_s0 = inlined_call_operand.vmem [shape: c64[2,4,17,17], index: 0, kind: input, shape index: {}]   ;;  %s297_s1 = inlined_call_operand.vmem [shape: f32[2,4,17,17], index: 1, kind: output, shape index: {}]  }
   0x1   :  { %v2_v0 = vld [vmem:[%s296_s0] sm:$0xff]  ;;  %v96_v1 = vld [vmem:[%s296_s0 + $0x8] sm:$0xff]  ;;  %v98_v2 = vld [vmem:[%s296_s0 + $0x10] sm:$0xff] }
   0x2   :  { %3 = vst [vmem:[%s297_s1] sm:$0xff] %v2_v0  ;;  %97 = vst [vmem:[%s297_s1 + $0x8] sm:$0xff] %v96_v1  ;;  %v100_v3 = vld [vmem:[%s296_s0 + $0x18] sm:$0xff]  ;;  %v102_v4 = vld [vmem:[%s296_s0 + $0x20] sm:$0xff] }
   0x3   :  { %99 = vst [vmem:[%s297_s1 + $0x10] sm:$0xff] %v98_v2  ;;  %v104_v5 = vld [vmem:[%s296_s0 + $0x28] sm:$0xff]  ;;  %101 = vst [vmem:[%s297_s1 + $0x18] sm:$0xff] %v100_v3  ;;  %v106_v6 = vld [vmem:[%s296_s0 + $0x30] sm:$0xff] }
   0x4   :  { %103 = vst [vmem:[%s297_s1 + $0x20] sm:$0xff] %v102_v4  ;;  %105 = vst [vmem:[%s297_s1 + $0x28] sm:$0xff] %v104_v5  ;;  %v108_v7 = vld [vmem:[%s296_s0 + $0x38] sm:$0xff]  ;;  %v110_v8 = vld [vmem:[%s296_s0 + $0x40] sm:$0xff] }
   0x5   :  { %107 = vst [vmem:[%s297_s1 + $0x30] sm:$0xff] %v106_v6  ;;  %109 = vst [vmem:[%s297_s1 + $0x38] sm:$0xff] %v108_v7  ;;  %v112_v9 = vld [vmem:[%s296_s0 + $0x48] sm:$0xff]  ;;  %v114_v10 = vld [vmem:[%s296_s0 + $0x50] sm:$0xff] }
   0x6   :  { %111 = vst [vmem:[%s297_s1 + $0x40] sm:$0xff] %v110_v8  ;;  %v116_v11 = vld [vmem:[%s296_s0 + $0x58] sm:$0xff]  ;;  %113 = vst [vmem:[%s297_s1 + $0x48] sm:$0xff] %v112_v9  ;;  %v118_v12 = vld [vmem:[%s296_s0 + $0x60] sm:$0xff] }
   0x7   :  { %115 = vst [vmem:[%s297_s1 + $0x50] sm:$0xff] %v114_v10  ;;  %117 = vst [vmem:[%s297_s1 + $0x58] sm:$0xff] %v116_v11  ;;  %v120_v13 = vld [vmem:[%s296_s0 + $0x68] sm:$0xff]  ;;  %v122_v14 = vld [vmem:[%s296_s0 + $0x70] sm:$0xff] }
   0x8   :  { %119 = vst [vmem:[%s297_s1 + $0x60] sm:$0xff] %v118_v12  ;;  %121 = vst [vmem:[%s297_s1 + $0x68] sm:$0xff] %v120_v13  ;;  %v124_v15 = vld [vmem:[%s296_s0 + $0x78] sm:$0xff]  ;;  %v126_v16 = vld [vmem:[%s296_s0 + $0x80] sm:$0xff] }
   0x9   :  { %123 = vst [vmem:[%s297_s1 + $0x70] sm:$0xff] %v122_v14  ;;  %v128_v17 = vld [vmem:[%s296_s0 + $0x88] sm:$0xff]  ;;  %125 = vst [vmem:[%s297_s1 + $0x78] sm:$0xff] %v124_v15  ;;  %v130_v18 = vld [vmem:[%s296_s0 + $0x90] sm:$0xff] }
   0xa   :  { %127 = vst [vmem:[%s297_s1 + $0x80] sm:$0xff] %v126_v16  ;;  %129 = vst [vmem:[%s297_s1 + $0x88] sm:$0xff] %v128_v17  ;;  %v132_v19 = vld [vmem:[%s296_s0 + $0x98] sm:$0xff]  ;;  %v134_v20 = vld [vmem:[%s296_s0 + $0xa0] sm:$0xff] }
   0xb   :  { %131 = vst [vmem:[%s297_s1 + $0x90] sm:$0xff] %v130_v18  ;;  %133 = vst [vmem:[%s297_s1 + $0x98] sm:$0xff] %v132_v19  ;;  %v136_v21 = vld [vmem:[%s296_s0 + $0xa8] sm:$0xff]  ;;  %v138_v22 = vld [vmem:[%s296_s0 + $0xb0] sm:$0xff] }
   0xc   :  { %135 = vst [vmem:[%s297_s1 + $0xa0] sm:$0xff] %v134_v20  ;;  %v140_v23 = vld [vmem:[%s296_s0 + $0xb8] sm:$0xff]  ;;  %137 = vst [vmem:[%s297_s1 + $0xa8] sm:$0xff] %v136_v21 }
   0xd   :  { %139 = vst [vmem:[%s297_s1 + $0xb0] sm:$0xff] %v138_v22  ;;  %141 = vst [vmem:[%s297_s1 + $0xb8] sm:$0xff] %v140_v23 }

// kernel: forward.1
= control target key start
LH: loop header
LB: loop body
LE: loop exit
PB: predicated region body
PF: predicated region fallthrough
CT: control target
= control target key end

     0   :  { %v23_v0 = vlaneseq  ;;  %s169_s2 = inlined_call_operand.vmem [shape: f32[1,640], index: 2, kind: input, shape index: {}]   ;;  %s170_s0 = inlined_call_operand.vmem [shape: f32[8,640], index: 0, kind: input, shape index: {}, may-alias: {0,3}]   ;;  %s171_s1 = inlined_call_operand.vmem [shape: f32[8,640], index: 1, kind: input, shape index: {}, may-alias: {1,4}]   ;;  %s172_s3 = inlined_call_operand.vmem [shape: f32[8,640], index: 3, kind: output, shape index: {0}, may-alias: {0,3}]   ;;  %s173_s4 = inlined_call_operand.vmem [shape: f32[8,640], index: 4, kind: output, shape index: {1}, may-alias: {1,4}]  }
   0x1   :  { %v16_v2 = vld [vmem:[%s169_s2] sm:$0x1f]  ;;  %v18_v5 = vld [vmem:[%s170_s0 + $0x8] sm:$0xff]  ;;  %v19_v9 = vld [vmem:[%s170_s0 + $0x10] sm:$0xff] }
   0x2   :  { %v24_v1 = vshrl.u32 %v23_v0, 7  ;;  %v17_v3 = vld [vmem:[%s170_s0] sm:$0xff]  ;;  %v20_v10 = vld [vmem:[%s170_s0 + $0x18] sm:$0xff]  ;;  %v59_v18 = vld [vmem:[%s171_s1 + $0x8] sm:$0xff] }
   0x3   :  { %v21_v11 = vld [vmem:[%s170_s0 + $0x20] sm:$0xff]  ;;  %v60_v19 = vld [vmem:[%s171_s1 + $0x10] sm:$0xff]  ;;  %v61_v21 = vld [vmem:[%s171_s1 + $0x18] sm:$0xff] }
   0x4   :  { %v25_v4 = vsub.s32 0, %v24_v1  ;;  %v29_v6 = vsub.s32 1, %v24_v1  ;;  %v33_v7 = vsub.s32 2, %v24_v1  ;;  %v37_v8 = vsub.s32 3, %v24_v1  ;;  %v58_v17 = vld [vmem:[%s171_s1] sm:$0xff] }
   0x5   :  { %v41_v12 = vsub.s32 4, %v24_v1  ;;  %v62_v22 = vld [vmem:[%s171_s1 + $0x20] sm:$0xff] }
   0x6   :  { %v26_v13 = vrot.slane %v16_v2, %v25_v4  ;;  %v30_v14 = vrot.slane %v16_v2, %v29_v6  ;;  %v34_v15 = vrot.slane %v16_v2, %v33_v7  ;;  %v38_v16 = vrot.slane %v16_v2, %v37_v8 }
   0x7   :  { %v42_v20 = vrot.slane %v16_v2, %v41_v12 }
   0x8   :  { %v48_v23 = vmul.f32 %v26_v13, %v17_v3  ;;  %v49_v24 = vmul.f32 %v30_v14, %v18_v5  ;;  %v50_v25 = vmul.f32 %v34_v15, %v19_v9  ;;  %v51_v26 = vmul.f32 %v38_v16, %v20_v10 }
   0x9   :  { %v52_v27 = vmul.f32 %v42_v20, %v21_v11  ;;  %v63_v28 = vmul.f32 %v58_v17, %v26_v13  ;;  %v64_v29 = vmul.f32 %v59_v18, %v30_v14  ;;  %v65_v30 = vmul.f32 %v60_v19, %v34_v15 }
   0xa   :  { %53 = vst [vmem:[%s172_s3] sm:$0xff] %v48_v23  ;;  %54 = vst [vmem:[%s172_s3 + $0x8] sm:$0xff] %v49_v24  ;;  %v66_v31 = vmul.f32 %v61_v21, %v38_v16  ;;  %v67_v32 = vmul.f32 %v62_v22, %v42_v20 }
   0xb   :  { %55 = vst [vmem:[%s172_s3 + $0x10] sm:$0xff] %v50_v25  ;;  %56 = vst [vmem:[%s172_s3 + $0x18] sm:$0xff] %v51_v26 }
   0xc   :  { %57 = vst [vmem:[%s172_s3 + $0x20] sm:$0xff] %v52_v27  ;;  %68 = vst [vmem:[%s173_s4] sm:$0xff] %v63_v28 }
   0xd   :  { %69 = vst [vmem:[%s173_s4 + $0x8] sm:$0xff] %v64_v29  ;;  %70 = vst [vmem:[%s173_s4 + $0x10] sm:$0xff] %v65_v30 }
   0xe   :  { %71 = vst [vmem:[%s173_s4 + $0x18] sm:$0xff] %v66_v31  ;;  %72 = vst [vmem:[%s173_s4 + $0x20] sm:$0xff] %v67_v32 }

// kernel: custom-call.2
= control target key start
LH: loop header
LB: loop body
LE: loop exit
PB: predicated region body
PF: predicated region fallthrough
CT: control target
= control target key end

     0   :  { %s612_s0 = inlined_call_operand.vmem [shape: f32[2,4,17,17], index: 0, kind: input, shape index: {}]   ;;  %s613_s2 = inlined_call_operand.vmem [shape: c64[2,4,17,17], index: 2, kind: output, shape index: {}]   ;;  %s614_s1 = inlined_call_operand.vmem [shape: f32[2,4,17,17], index: 1, kind: input, shape index: {}]  }
   0x1   :  { %v5_v0 = vld [vmem:[%s612_s0] sm:$0xff]  ;;  %v216_v1 = vld [vmem:[%s612_s0 + $0x8] sm:$0xff]  ;;  %v218_v2 = vld [vmem:[%s612_s0 + $0x10] sm:$0xff] }
   0x2   :  { %6 = vst [vmem:[%s613_s2] sm:$0xff] %v5_v0  ;;  %217 = vst [vmem:[%s613_s2 + $0x8] sm:$0xff] %v216_v1  ;;  %v220_v3 = vld [vmem:[%s612_s0 + $0x18] sm:$0xff]  ;;  %v222_v4 = vld [vmem:[%s612_s0 + $0x20] sm:$0xff] }
   0x3   :  { %219 = vst [vmem:[%s613_s2 + $0x10] sm:$0xff] %v218_v2  ;;  %v224_v5 = vld [vmem:[%s612_s0 + $0x28] sm:$0xff]  ;;  %221 = vst [vmem:[%s613_s2 + $0x18] sm:$0xff] %v220_v3  ;;  %v226_v6 = vld [vmem:[%s612_s0 + $0x30] sm:$0xff] }
   0x4   :  { %223 = vst [vmem:[%s613_s2 + $0x20] sm:$0xff] %v222_v4  ;;  %225 = vst [vmem:[%s613_s2 + $0x28] sm:$0xff] %v224_v5  ;;  %v228_v7 = vld [vmem:[%s612_s0 + $0x38] sm:$0xff]  ;;  %v230_v8 = vld [vmem:[%s612_s0 + $0x40] sm:$0xff] }
   0x5   :  { %227 = vst [vmem:[%s613_s2 + $0x30] sm:$0xff] %v226_v6  ;;  %229 = vst [vmem:[%s613_s2 + $0x38] sm:$0xff] %v228_v7  ;;  %v232_v9 = vld [vmem:[%s612_s0 + $0x48] sm:$0xff]  ;;  %v234_v10 = vld [vmem:[%s612_s0 + $0x50] sm:$0xff] }
   0x6   :  { %231 = vst [vmem:[%s613_s2 + $0x40] sm:$0xff] %v230_v8  ;;  %v236_v11 = vld [vmem:[%s612_s0 + $0x58] sm:$0xff]  ;;  %233 = vst [vmem:[%s613_s2 + $0x48] sm:$0xff] %v232_v9  ;;  %v238_v12 = vld [vmem:[%s612_s0 + $0x60] sm:$0xff] }
   0x7   :  { %235 = vst [vmem:[%s613_s2 + $0x50] sm:$0xff] %v234_v10  ;;  %237 = vst [vmem:[%s613_s2 + $0x58] sm:$0xff] %v236_v11  ;;  %v240_v13 = vld [vmem:[%s612_s0 + $0x68] sm:$0xff]  ;;  %v242_v14 = vld [vmem:[%s612_s0 + $0x70] sm:$0xff] }
   0x8   :  { %239 = vst [vmem:[%s613_s2 + $0x60] sm:$0xff] %v238_v12  ;;  %241 = vst [vmem:[%s613_s2 + $0x68] sm:$0xff] %v240_v13  ;;  %v244_v15 = vld [vmem:[%s612_s0 + $0x78] sm:$0xff]  ;;  %v246_v16 = vld [vmem:[%s612_s0 + $0x80] sm:$0xff] }
   0x9   :  { %243 = vst [vmem:[%s613_s2 + $0x70] sm:$0xff] %v242_v14  ;;  %v248_v17 = vld [vmem:[%s612_s0 + $0x88] sm:$0xff]  ;;  %245 = vst [vmem:[%s613_s2 + $0x78] sm:$0xff] %v244_v15  ;;  %v250_v18 = vld [vmem:[%s612_s0 + $0x90] sm:$0xff] }
   0xa   :  { %247 = vst [vmem:[%s613_s2 + $0x80] sm:$0xff] %v246_v16  ;;  %249 = vst [vmem:[%s613_s2 + $0x88] sm:$0xff] %v248_v17  ;;  %v252_v19 = vld [vmem:[%s612_s0 + $0x98] sm:$0xff]  ;;  %v254_v20 = vld [vmem:[%s612_s0 + $0xa0] sm:$0xff] }
   0xb   :  { %251 = vst [vmem:[%s613_s2 + $0x90] sm:$0xff] %v250_v18  ;;  %253 = vst [vmem:[%s613_s2 + $0x98] sm:$0xff] %v252_v19  ;;  %v256_v21 = vld [vmem:[%s612_s0 + $0xa8] sm:$0xff]  ;;  %v258_v22 = vld [vmem:[%s612_s0 + $0xb0] sm:$0xff] }
   0xc   :  { %255 = vst [vmem:[%s613_s2 + $0xa0] sm:$0xff] %v254_v20  ;;  %v260_v23 = vld [vmem:[%s612_s0 + $0xb8] sm:$0xff]  ;;  %257 = vst [vmem:[%s613_s2 + $0xa8] sm:$0xff] %v256_v21  ;;  %v99_v24 = vld [vmem:[%s614_s1] sm:$0xff] }
   0xd   :  { %259 = vst [vmem:[%s613_s2 + $0xb0] sm:$0xff] %v258_v22  ;;  %261 = vst [vmem:[%s613_s2 + $0xb8] sm:$0xff] %v260_v23  ;;  %v263_v25 = vld [vmem:[%s614_s1 + $0x8] sm:$0xff]  ;;  %v265_v26 = vld [vmem:[%s614_s1 + $0x10] sm:$0xff] }
   0xe   :  { %262 = vst [vmem:[%s613_s2 + $0xc0] sm:$0xff] %v99_v24  ;;  %264 = vst [vmem:[%s613_s2 + $0xc8] sm:$0xff] %v263_v25  ;;  %v267_v27 = vld [vmem:[%s614_s1 + $0x18] sm:$0xff]  ;;  %v269_v28 = vld [vmem:[%s614_s1 + $0x20] sm:$0xff] }
   0xf   :  { %266 = vst [vmem:[%s613_s2 + $0xd0] sm:$0xff] %v265_v26  ;;  %v271_v29 = vld [vmem:[%s614_s1 + $0x28] sm:$0xff]  ;;  %268 = vst [vmem:[%s613_s2 + $0xd8] sm:$0xff] %v267_v27  ;;  %v273_v30 = vld [vmem:[%s614_s1 + $0x30] sm:$0xff] }
  0x10   :  { %270 = vst [vmem:[%s613_s2 + $0xe0] sm:$0xff] %v269_v28  ;;  %272 = vst [vmem:[%s613_s2 + $0xe8] sm:$0xff] %v271_v29  ;;  %v275_v31 = vld [vmem:[%s614_s1 + $0x38] sm:$0xff]  ;;  %v277_v32 = vld [vmem:[%s614_s1 + $0x40] sm:$0xff] }
  0x11   :  { %274 = vst [vmem:[%s613_s2 + $0xf0] sm:$0xff] %v273_v30  ;;  %276 = vst [vmem:[%s613_s2 + $0xf8] sm:$0xff] %v275_v31  ;;  %v279_v33 = vld [vmem:[%s614_s1 + $0x48] sm:$0xff]  ;;  %v281_v34 = vld [vmem:[%s614_s1 + $0x50] sm:$0xff] }
  0x12   :  { %278 = vst [vmem:[%s613_s2 + $0x100] sm:$0xff] %v277_v32  ;;  %v283_v35 = vld [vmem:[%s614_s1 + $0x58] sm:$0xff]  ;;  %280 = vst [vmem:[%s613_s2 + $0x108] sm:$0xff] %v279_v33  ;;  %v285_v36 = vld [vmem:[%s614_s1 + $0x60] sm:$0xff] }
  0x13   :  { %282 = vst [vmem:[%s613_s2 + $0x110] sm:$0xff] %v281_v34  ;;  %284 = vst [vmem:[%s613_s2 + $0x118] sm:$0xff] %v283_v35  ;;  %v287_v37 = vld [vmem:[%s614_s1 + $0x68] sm:$0xff]  ;;  %v289_v38 = vld [vmem:[%s614_s1 + $0x70] sm:$0xff] }
  0x14   :  { %286 = vst [vmem:[%s613_s2 + $0x120] sm:$0xff] %v285_v36  ;;  %288 = vst [vmem:[%s613_s2 + $0x128] sm:$0xff] %v287_v37  ;;  %v291_v39 = vld [vmem:[%s614_s1 + $0x78] sm:$0xff]  ;;  %v293_v40 = vld [vmem:[%s614_s1 + $0x80] sm:$0xff] }
  0x15   :  { %290 = vst [vmem:[%s613_s2 + $0x130] sm:$0xff] %v289_v38  ;;  %v295_v41 = vld [vmem:[%s614_s1 + $0x88] sm:$0xff]  ;;  %292 = vst [vmem:[%s613_s2 + $0x138] sm:$0xff] %v291_v39  ;;  %v297_v42 = vld [vmem:[%s614_s1 + $0x90] sm:$0xff] }
  0x16   :  { %294 = vst [vmem:[%s613_s2 + $0x140] sm:$0xff] %v293_v40  ;;  %296 = vst [vmem:[%s613_s2 + $0x148] sm:$0xff] %v295_v41  ;;  %v299_v43 = vld [vmem:[%s614_s1 + $0x98] sm:$0xff]  ;;  %v301_v44 = vld [vmem:[%s614_s1 + $0xa0] sm:$0xff] }
  0x17   :  { %298 = vst [vmem:[%s613_s2 + $0x150] sm:$0xff] %v297_v42  ;;  %300 = vst [vmem:[%s613_s2 + $0x158] sm:$0xff] %v299_v43  ;;  %v303_v45 = vld [vmem:[%s614_s1 + $0xa8] sm:$0xff]  ;;  %v305_v46 = vld [vmem:[%s614_s1 + $0xb0] sm:$0xff] }
  0x18   :  { %302 = vst [vmem:[%s613_s2 + $0x160] sm:$0xff] %v301_v44  ;;  %v307_v47 = vld [vmem:[%s614_s1 + $0xb8] sm:$0xff]  ;;  %304 = vst [vmem:[%s613_s2 + $0x168] sm:$0xff] %v303_v45 }
  0x19   :  { %306 = vst [vmem:[%s613_s2 + $0x170] sm:$0xff] %v305_v46  ;;  %308 = vst [vmem:[%s613_s2 + $0x178] sm:$0xff] %v307_v47 }

</bundles_post_ra>
